<compile_context>
chip_gen: v5e
topology: v5e:2x2
jax: 0.10.0
libtpu: 0.0.40
codegen_flags: <defaults>
</compile_context>

<pallas_src>
import functools

import jax
import jax.numpy as jnp
import numpy as np
from jax import lax
from jax.experimental import pallas as pl
from jax.experimental.pallas import tpu as pltpu


# --------------------------------------------------------------------------- #
# Kernel
# --------------------------------------------------------------------------- #
def _fft2_real_kernel(x_ref, wrc_ref, wrs_ref, wlc_ref, wls_ref, o_ref,
                      yc_ref, ys_ref):
    bt, s, h = x_ref.shape
    cdtype = wrc_ref.dtype          # MXU input dtype (bf16 or f32)

    # ---- hidden-dim DFT: whole batch block folded into the MXU M dim -------
    x2 = x_ref[...].reshape(bt * s, h).astype(cdtype)                    # (Bt*S, H)
    yc = jnp.dot(x2, wrc_ref[...], preferred_element_type=jnp.float32)   # (Bt*S, H)
    ys = jnp.dot(x2, wrs_ref[...], preferred_element_type=jnp.float32)   # (Bt*S, H)
    # Single cast (f32 accumulator -> MXU dtype), staged into VMEM scratch so
    # the per-batch loop below only keeps one batch element live.
    yc_ref[...] = yc.astype(cdtype).reshape(bt, s, h)
    ys_ref[...] = ys.astype(cdtype).reshape(bt, s, h)

    # ---- seq-dim DFT: out[b] = C_S @ y_c[b] + S_S @ y_s[b] ------------------
    # Split weights => no (2S, H) concat temp on the matmul critical path.
    def body(b, carry):
        ob = jnp.dot(wlc_ref[...], yc_ref[b], preferred_element_type=jnp.float32)
        ob = ob + jnp.dot(wls_ref[...], ys_ref[b], preferred_element_type=jnp.float32)
        o_ref[b] = ob.astype(o_ref.dtype)
        return carry

    lax.fori_loop(0, bt, body, 0, unroll=bt <= 8)


# --------------------------------------------------------------------------- #
# Host-side helpers
# --------------------------------------------------------------------------- #
def _dft_weights(s, h, dtype):
    """Split DFT weights.  The norm='forward' 1/(S*H) scale and the cos-sin
    subtraction sign are folded into the hidden-side weights so the kernel does
    no per-element VPU scaling/subtraction."""
    ks = np.arange(s)
    kh = np.arange(h)
    ang_s = 2.0 * np.pi * np.outer(ks, ks) / float(s)
    ang_h = 2.0 * np.pi * np.outer(kh, kh) / float(h)
    scale = 1.0 / float(s * h)
    wr_c = np.cos(ang_h) * scale          # (H, H)
    wr_s = -np.sin(ang_h) * scale         # (H, H)  (subtraction sign folded in)
    wl_c = np.cos(ang_s)                  # (S, S)
    wl_s = np.sin(ang_s)                  # (S, S)
    to = lambda a: jnp.asarray(a, dtype=dtype)
    return to(wr_c), to(wr_s), to(wl_c), to(wl_s)


@functools.lru_cache(maxsize=1)
def _vmem_capacity_bytes():
    """Per-core VMEM capacity; conservative v7x fallback if the query fails."""
    try:
        info_fn = getattr(pltpu, "get_tpu_info", None)
        if info_fn is not None:
            cap = int(info_fn().vmem_capacity_bytes)
            if cap > 0:
                return cap
    except Exception:
        pass
    return 64 * 1024 * 1024


def _pick_batch_block(b, s, h, w_itemsize, weight_copies):
    """Largest batch block that (a) divides B, (b) keeps >=2 grid steps when
    possible (both v7x TensorCores get work on the 'parallel' batch axis,
    preferring an even step count) and (c) fits ~70% of per-core VMEM alongside
    the constant weights."""
    budget = int(_vmem_capacity_bytes() * 0.70)          # ~90 MiB v5e/v6e, ~45 MiB v7x
    weights = weight_copies * (2 * s * s + 2 * h * h) * w_itemsize
    # per batch element: x + out double-buffered (f32) + y_c/y_s scratch (cdtype)
    per_elem = s * h * (4 * 4 + 2 * w_itemsize)
    avail = max(budget - weights, per_elem)
    cap = max(1, avail // per_elem)
    if b >= 2:
        cap = min(cap, b // 2)                           # keep >= 2 grid steps
    cap = int(max(1, min(cap, b)))
    divisors = [d for d in range(cap, 0, -1) if b % d == 0]
    best = divisors[0]
    for d in divisors:                                   # prefer even step counts (2 TCs)
        if (b // d) % 2 == 0 and 2 * d >= best:
            return d
    return best


# --------------------------------------------------------------------------- #
# pallas_call wrapper
# --------------------------------------------------------------------------- #
@functools.partial(jax.jit,
                   static_argnames=("use_bf16", "block_b", "single_buffer_weights"))
def _fft2_impl(x, use_bf16, block_b, single_buffer_weights):
    b, s, h = x.shape
    w_dtype = jnp.bfloat16 if use_bf16 else jnp.float32
    wsize = np.dtype(w_dtype).itemsize
    weight_copies = 1 if single_buffer_weights else 2

    wr_c, wr_s, wl_c, wl_s = _dft_weights(s, h, w_dtype)

    bt = block_b if block_b is not None else _pick_batch_block(
        b, s, h, wsize, weight_copies)
    if b % bt != 0:
        raise ValueError(f"block_b={bt} must divide batch={b}")
    grid = (b // bt,)

    # VMEM requirement; never clamp the scoped limit below what we actually use.
    weights_bytes = weight_copies * (2 * s * s + 2 * h * h) * wsize
    blk_bytes = bt * s * h * (4 * 4 + 2 * wsize)
    vmem_limit = int(max(weights_bytes + blk_bytes + (4 << 20), 16 << 20))

    # Constant weights: constant index_map => fetched once and revisited; a
    # single buffer is enough (double-buffering them is wasted VMEM).
    w_mode = dict(pipeline_mode=pl.Buffered(1)) if single_buffer_weights else {}

    grid_spec = pltpu.PrefetchScalarGridSpec(
        num_scalar_prefetch=0,
        grid=grid,
        in_specs=[
            pl.BlockSpec((bt, s, h), lambda i: (i, 0, 0)),          # x batch block
            pl.BlockSpec((h, h), lambda i: (0, 0), **w_mode),       # Wr_c
            pl.BlockSpec((h, h), lambda i: (0, 0), **w_mode),       # Wr_s
            pl.BlockSpec((s, s), lambda i: (0, 0), **w_mode),       # Wl_c
            pl.BlockSpec((s, s), lambda i: (0, 0), **w_mode),       # Wl_s
        ],
        out_specs=pl.BlockSpec((bt, s, h), lambda i: (i, 0, 0)),
        scratch_shapes=[
            pltpu.VMEM((bt, s, h), w_dtype),                         # y_c staging
            pltpu.VMEM((bt, s, h), w_dtype),                         # y_s staging
        ],
    )

    cost = pl.CostEstimate(
        flops=4 * b * s * h * (s + h),
        transcendentals=0,
        bytes_accessed=2 * b * s * h * 4 + (2 * s * s + 2 * h * h) * wsize,
    )

    return pl.pallas_call(
        _fft2_real_kernel,
        out_shape=jax.ShapeDtypeStruct((b, s, h), jnp.float32),
        grid_spec=grid_spec,
        compiler_params=pltpu.CompilerParams(
            dimension_semantics=("parallel",),   # independent batch blocks
            vmem_limit_bytes=vmem_limit,
        ),
        cost_estimate=cost,
    )(x, wr_c, wr_s, wl_c, wl_s)


_WEIGHTS_SINGLE_BUFFER = [None]   # resolved on first call (Buffered(1) supported?)


def fft2_real_forward(x, *, use_bf16=True, block_b=None):
    """Pallas TPU implementation of torch.fft.fft2(x, dim=(-1,-2), norm='forward').real.

    use_bf16=True (default) runs the MXU with bf16 inputs and f32 accumulation;
    use_bf16=False gives the tight-tolerance f32 path."""
    if _WEIGHTS_SINGLE_BUFFER[0] is None:
        try:
            out = _fft2_impl(x, use_bf16=use_bf16, block_b=block_b,
                             single_buffer_weights=True)
            jax.block_until_ready(out)
            _WEIGHTS_SINGLE_BUFFER[0] = True
            return out
        except Exception:
            # This Pallas build rejects single-buffered constant inputs; fall
            # back to default double-buffering (correct, slightly more VMEM).
            _WEIGHTS_SINGLE_BUFFER[0] = False
    return _fft2_impl(x, use_bf16=use_bf16, block_b=block_b,
                      single_buffer_weights=_WEIGHTS_SINGLE_BUFFER[0])


# --------------------------------------------------------------------------- #
# Demo / self-test
# --------------------------------------------------------------------------- #
if __name__ == "__main__":
    key = jax.random.PRNGKey(0)
    B, S, H = 2, 8, 32   # (batch, seq_len, hidden) -- small demo shapes
    x = jax.random.normal(key, (B, S, H), dtype=jnp.float32)

    # Reference: same semantics as torch.fft.fft2(x, dim=(-1,-2), norm='forward').real
    ref = jnp.fft.fft2(x, axes=(-1, -2), norm="forward").real

    # f32 MXU path: tight match to the reference.
    out_f32 = jax.block_until_ready(fft2_real_forward(x, use_bf16=False))
    np.testing.assert_allclose(np.asarray(out_f32), np.asarray(ref),
                               atol=1e-4, rtol=1e-4)

    # Default bf16-MXU path (f32 accumulation): looser tolerance for the
    # bf16 cos/sin quantization.
    out = jax.block_until_ready(fft2_real_forward(x))
    np.testing.assert_allclose(np.asarray(out), np.asarray(ref),
                               atol=2e-2, rtol=5e-2)

    print("KERNEL_OK")
</pallas_src>

<mosaic_0001>
module attributes {stable_mosaic.version = 11 : i64} {
  func.func @_fft2_real_kernel(%arg0: i32, %arg1: memref<1x8x32xf32, #tpu.memory_space<vmem>>, %arg2: memref<32x32xf32, #tpu.memory_space<vmem>>, %arg3: memref<32x32xf32, #tpu.memory_space<vmem>>, %arg4: memref<8x8xf32, #tpu.memory_space<vmem>>, %arg5: memref<8x8xf32, #tpu.memory_space<vmem>>, %arg6: memref<1x8x32xf32, #tpu.memory_space<vmem>>, %arg7: memref<1x8x32xf32, #tpu.memory_space<vmem>>, %arg8: memref<1x8x32xf32, #tpu.memory_space<vmem>>) attributes {dimension_semantics = [#tpu.dimension_semantics<parallel>], iteration_bounds = array<i64: 2>, scalar_prefetch = 0 : i64, scratch_operands = 2 : i64, tpu.core_type = #tpu.core_type<tc>, window_params = [{transform_indices = @transform_0, window_bounds = array<i64: 1, 8, 32>}, {pipeline_mode = #tpu.pipeline_mode<synchronous>, transform_indices = @transform_1, window_bounds = array<i64: 32, 32>}, {pipeline_mode = #tpu.pipeline_mode<synchronous>, transform_indices = @transform_2, window_bounds = array<i64: 32, 32>}, {pipeline_mode = #tpu.pipeline_mode<synchronous>, transform_indices = @transform_3, window_bounds = array<i64: 8, 8>}, {pipeline_mode = #tpu.pipeline_mode<synchronous>, transform_indices = @transform_4, window_bounds = array<i64: 8, 8>}, {transform_indices = @transform_5, window_bounds = array<i64: 1, 8, 32>}]} {
    %c0 = arith.constant 0 : index
    %c0_0 = arith.constant 0 : index
    %c0_1 = arith.constant 0 : index
    %0 = vector.load %arg1[%c0, %c0_0, %c0_1] : memref<1x8x32xf32, #tpu.memory_space<vmem>>, vector<1x8x32xf32>
    %1 = vector.shape_cast %0 : vector<1x8x32xf32> to vector<8x32xf32>
    %c0_2 = arith.constant 0 : index
    %c0_3 = arith.constant 0 : index
    %2 = vector.load %arg2[%c0_2, %c0_3] : memref<32x32xf32, #tpu.memory_space<vmem>>, vector<32x32xf32>
    %cst = arith.constant dense<0.000000e+00> : vector<8x32xf32>
    %3 = tpu.matmul %1, %2, %cst {dimension_numbers = #tpu.dot_dimension_numbers<[1], [0], [0], [1], [0, 0, 1, 1], [], []>} : vector<8x32xf32>, vector<32x32xf32>, vector<8x32xf32> -> vector<8x32xf32>
    %c0_4 = arith.constant 0 : index
    %c0_5 = arith.constant 0 : index
    %4 = vector.load %arg3[%c0_4, %c0_5] : memref<32x32xf32, #tpu.memory_space<vmem>>, vector<32x32xf32>
    %cst_6 = arith.constant dense<0.000000e+00> : vector<8x32xf32>
    %5 = tpu.matmul %1, %4, %cst_6 {dimension_numbers = #tpu.dot_dimension_numbers<[1], [0], [0], [1], [0, 0, 1, 1], [], []>} : vector<8x32xf32>, vector<32x32xf32>, vector<8x32xf32> -> vector<8x32xf32>
    %6 = vector.shape_cast %3 : vector<8x32xf32> to vector<1x8x32xf32>
    %c0_7 = arith.constant 0 : index
    %c0_8 = arith.constant 0 : index
    %c0_9 = arith.constant 0 : index
    %7 = vector.load %arg7[%c0_7, %c0_8, %c0_9] : memref<1x8x32xf32, #tpu.memory_space<vmem>>, vector<1x8x32xf32>
    tpu.vector_store %arg7[%c0_7, %c0_8, %c0_9], %6 {strides = array<i32>} : memref<1x8x32xf32, #tpu.memory_space<vmem>>, vector<1x8x32xf32>,
    %8 = vector.shape_cast %5 : vector<8x32xf32> to vector<1x8x32xf32>
    %c0_10 = arith.constant 0 : index
    %c0_11 = arith.constant 0 : index
    %c0_12 = arith.constant 0 : index
    %9 = vector.load %arg8[%c0_10, %c0_11, %c0_12] : memref<1x8x32xf32, #tpu.memory_space<vmem>>, vector<1x8x32xf32>
    tpu.vector_store %arg8[%c0_10, %c0_11, %c0_12], %8 {strides = array<i32>} : memref<1x8x32xf32, #tpu.memory_space<vmem>>, vector<1x8x32xf32>,
    %c0_i32 = arith.constant 0 : i32
    %c0_13 = arith.constant 0 : index
    %c0_14 = arith.constant 0 : index
    %10 = vector.load %arg4[%c0_13, %c0_14] : memref<8x8xf32, #tpu.memory_space<vmem>>, vector<8x8xf32>
    %11 = arith.index_cast %c0_i32 : i32 to index
    %c0_15 = arith.constant 0 : index
    %c0_16 = arith.constant 0 : index
    %12 = vector.load %arg7[%11, %c0_15, %c0_16] : memref<1x8x32xf32, #tpu.memory_space<vmem>>, vector<1x8x32xf32>
    %13 = vector.shape_cast %12 : vector<1x8x32xf32> to vector<8x32xf32>
    %cst_17 = arith.constant dense<0.000000e+00> : vector<8x32xf32>
    %14 = tpu.matmul %10, %13, %cst_17 {dimension_numbers = #tpu.dot_dimension_numbers<[1], [0], [0], [1], [0, 0, 1, 1], [], []>} : vector<8x8xf32>, vector<8x32xf32>, vector<8x32xf32> -> vector<8x32xf32>
    %c0_18 = arith.constant 0 : index
    %c0_19 = arith.constant 0 : index
    %15 = vector.load %arg5[%c0_18, %c0_19] : memref<8x8xf32, #tpu.memory_space<vmem>>, vector<8x8xf32>
    %16 = arith.index_cast %c0_i32 : i32 to index
    %c0_20 = arith.constant 0 : index
    %c0_21 = arith.constant 0 : index
    %17 = vector.load %arg8[%16, %c0_20, %c0_21] : memref<1x8x32xf32, #tpu.memory_space<vmem>>, vector<1x8x32xf32>
    %18 = vector.shape_cast %17 : vector<1x8x32xf32> to vector<8x32xf32>
    %cst_22 = arith.constant dense<0.000000e+00> : vector<8x32xf32>
    %19 = tpu.matmul %15, %18, %cst_22 {dimension_numbers = #tpu.dot_dimension_numbers<[1], [0], [0], [1], [0, 0, 1, 1], [], []>} : vector<8x8xf32>, vector<8x32xf32>, vector<8x32xf32> -> vector<8x32xf32>
    %20 = arith.addf %14, %19 : vector<8x32xf32>
    %21 = arith.index_cast %c0_i32 : i32 to index
    %c0_23 = arith.constant 0 : index
    %c0_24 = arith.constant 0 : index
    %22 = vector.load %arg6[%21, %c0_23, %c0_24] : memref<1x8x32xf32, #tpu.memory_space<vmem>>, vector<1x8x32xf32>
    %23 = vector.shape_cast %22 : vector<1x8x32xf32> to vector<8x32xf32>
    %24 = vector.shape_cast %20 : vector<8x32xf32> to vector<1x8x32xf32>
    tpu.vector_store %arg6[%21, %c0_23, %c0_24], %24 {strides = array<i32>} : memref<1x8x32xf32, #tpu.memory_space<vmem>>, vector<1x8x32xf32>,
    %c1_i32 = arith.constant 1 : i32
    return
  }
  func.func @transform_0(%arg0: i32) -> (i32, i32, i32) {
    %c0_i32 = arith.constant 0 : i32
    %c0_i32_0 = arith.constant 0 : i32
    %c0_i32_1 = arith.constant 0 : i32
    return %arg0, %c0_i32, %c0_i32_0 : i32, i32, i32
  }
  func.func @transform_1(%arg0: i32) -> (i32, i32) {
    %c0_i32 = arith.constant 0 : i32
    %c0_i32_0 = arith.constant 0 : i32
    %c0_i32_1 = arith.constant 0 : i32
    return %c0_i32, %c0_i32_0 : i32, i32
  }
  func.func @transform_2(%arg0: i32) -> (i32, i32) {
    %c0_i32 = arith.constant 0 : i32
    %c0_i32_0 = arith.constant 0 : i32
    %c0_i32_1 = arith.constant 0 : i32
    return %c0_i32, %c0_i32_0 : i32, i32
  }
  func.func @transform_3(%arg0: i32) -> (i32, i32) {
    %c0_i32 = arith.constant 0 : i32
    %c0_i32_0 = arith.constant 0 : i32
    %c0_i32_1 = arith.constant 0 : i32
    return %c0_i32, %c0_i32_0 : i32, i32
  }
  func.func @transform_4(%arg0: i32) -> (i32, i32) {
    %c0_i32 = arith.constant 0 : i32
    %c0_i32_0 = arith.constant 0 : i32
    %c0_i32_1 = arith.constant 0 : i32
    return %c0_i32, %c0_i32_0 : i32, i32
  }
  func.func @transform_5(%arg0: i32) -> (i32, i32, i32) {
    %c0_i32 = arith.constant 0 : i32
    %c0_i32_0 = arith.constant 0 : i32
    %c0_i32_1 = arith.constant 0 : i32
    return %arg0, %c0_i32, %c0_i32_0 : i32, i32, i32
  }
}

module attributes {stable_mosaic.version = 11 : i64} {
  func.func @_fft2_real_kernel(%arg0: i32, %arg1: memref<1x8x32xf32, #tpu.memory_space<vmem>>, %arg2: memref<32x32xf32, #tpu.memory_space<vmem>>, %arg3: memref<32x32xf32, #tpu.memory_space<vmem>>, %arg4: memref<8x8xf32, #tpu.memory_space<vmem>>, %arg5: memref<8x8xf32, #tpu.memory_space<vmem>>, %arg6: memref<1x8x32xf32, #tpu.memory_space<vmem>>, %arg7: memref<1x8x32xf32, #tpu.memory_space<vmem>>, %arg8: memref<1x8x32xf32, #tpu.memory_space<vmem>>) attributes {dimension_semantics = [#tpu.dimension_semantics<parallel>], iteration_bounds = array<i64: 2>, scalar_prefetch = 0 : i64, scratch_operands = 2 : i64, tpu.core_type = #tpu.core_type<tc>, window_params = [{transform_indices = @transform_0, window_bounds = array<i64: 1, 8, 32>}, {pipeline_mode = #tpu.pipeline_mode<synchronous>, transform_indices = @transform_1, window_bounds = array<i64: 32, 32>}, {pipeline_mode = #tpu.pipeline_mode<synchronous>, transform_indices = @transform_2, window_bounds = array<i64: 32, 32>}, {pipeline_mode = #tpu.pipeline_mode<synchronous>, transform_indices = @transform_3, window_bounds = array<i64: 8, 8>}, {pipeline_mode = #tpu.pipeline_mode<synchronous>, transform_indices = @transform_4, window_bounds = array<i64: 8, 8>}, {transform_indices = @transform_5, window_bounds = array<i64: 1, 8, 32>}]} {
    %c0 = arith.constant 0 : index
    %c0_0 = arith.constant 0 : index
    %c0_1 = arith.constant 0 : index
    %0 = vector.load %arg1[%c0, %c0_0, %c0_1] : memref<1x8x32xf32, #tpu.memory_space<vmem>>, vector<1x8x32xf32>
    %1 = vector.shape_cast %0 : vector<1x8x32xf32> to vector<8x32xf32>
    %c0_2 = arith.constant 0 : index
    %c0_3 = arith.constant 0 : index
    %2 = vector.load %arg2[%c0_2, %c0_3] : memref<32x32xf32, #tpu.memory_space<vmem>>, vector<32x32xf32>
    %cst = arith.constant dense<0.000000e+00> : vector<8x32xf32>
    %3 = tpu.matmul %1, %2, %cst {dimension_numbers = #tpu.dot_dimension_numbers<[1], [0], [0], [1], [0, 0, 1, 1], [], []>} : vector<8x32xf32>, vector<32x32xf32>, vector<8x32xf32> -> vector<8x32xf32>
    %c0_4 = arith.constant 0 : index
    %c0_5 = arith.constant 0 : index
    %4 = vector.load %arg3[%c0_4, %c0_5] : memref<32x32xf32, #tpu.memory_space<vmem>>, vector<32x32xf32>
    %cst_6 = arith.constant dense<0.000000e+00> : vector<8x32xf32>
    %5 = tpu.matmul %1, %4, %cst_6 {dimension_numbers = #tpu.dot_dimension_numbers<[1], [0], [0], [1], [0, 0, 1, 1], [], []>} : vector<8x32xf32>, vector<32x32xf32>, vector<8x32xf32> -> vector<8x32xf32>
    %6 = vector.shape_cast %3 : vector<8x32xf32> to vector<1x8x32xf32>
    %c0_7 = arith.constant 0 : index
    %c0_8 = arith.constant 0 : index
    %c0_9 = arith.constant 0 : index
    %7 = vector.load %arg7[%c0_7, %c0_8, %c0_9] : memref<1x8x32xf32, #tpu.memory_space<vmem>>, vector<1x8x32xf32>
    tpu.vector_store %arg7[%c0_7, %c0_8, %c0_9], %6 {strides = array<i32>} : memref<1x8x32xf32, #tpu.memory_space<vmem>>, vector<1x8x32xf32>,
    %8 = vector.shape_cast %5 : vector<8x32xf32> to vector<1x8x32xf32>
    %c0_10 = arith.constant 0 : index
    %c0_11 = arith.constant 0 : index
    %c0_12 = arith.constant 0 : index
    %9 = vector.load %arg8[%c0_10, %c0_11, %c0_12] : memref<1x8x32xf32, #tpu.memory_space<vmem>>, vector<1x8x32xf32>
    tpu.vector_store %arg8[%c0_10, %c0_11, %c0_12], %8 {strides = array<i32>} : memref<1x8x32xf32, #tpu.memory_space<vmem>>, vector<1x8x32xf32>,
    %c0_i32 = arith.constant 0 : i32
    %c0_13 = arith.constant 0 : index
    %c0_14 = arith.constant 0 : index
    %10 = vector.load %arg4[%c0_13, %c0_14] : memref<8x8xf32, #tpu.memory_space<vmem>>, vector<8x8xf32>
    %11 = arith.index_cast %c0_i32 : i32 to index
    %c0_15 = arith.constant 0 : index
    %c0_16 = arith.constant 0 : index
    %12 = vector.load %arg7[%11, %c0_15, %c0_16] : memref<1x8x32xf32, #tpu.memory_space<vmem>>, vector<1x8x32xf32>
    %13 = vector.shape_cast %12 : vector<1x8x32xf32> to vector<8x32xf32>
    %cst_17 = arith.constant dense<0.000000e+00> : vector<8x32xf32>
    %14 = tpu.matmul %10, %13, %cst_17 {dimension_numbers = #tpu.dot_dimension_numbers<[1], [0], [0], [1], [0, 0, 1, 1], [], []>} : vector<8x8xf32>, vector<8x32xf32>, vector<8x32xf32> -> vector<8x32xf32>
    %c0_18 = arith.constant 0 : index
    %c0_19 = arith.constant 0 : index
    %15 = vector.load %arg5[%c0_18, %c0_19] : memref<8x8xf32, #tpu.memory_space<vmem>>, vector<8x8xf32>
    %16 = arith.index_cast %c0_i32 : i32 to index
    %c0_20 = arith.constant 0 : index
    %c0_21 = arith.constant 0 : index
    %17 = vector.load %arg8[%16, %c0_20, %c0_21] : memref<1x8x32xf32, #tpu.memory_space<vmem>>, vector<1x8x32xf32>
    %18 = vector.shape_cast %17 : vector<1x8x32xf32> to vector<8x32xf32>
    %cst_22 = arith.constant dense<0.000000e+00> : vector<8x32xf32>
    %19 = tpu.matmul %15, %18, %cst_22 {dimension_numbers = #tpu.dot_dimension_numbers<[1], [0], [0], [1], [0, 0, 1, 1], [], []>} : vector<8x8xf32>, vector<8x32xf32>, vector<8x32xf32> -> vector<8x32xf32>
    %20 = arith.addf %14, %19 : vector<8x32xf32>
    %21 = arith.index_cast %c0_i32 : i32 to index
    %c0_23 = arith.constant 0 : index
    %c0_24 = arith.constant 0 : index
    %22 = vector.load %arg6[%21, %c0_23, %c0_24] : memref<1x8x32xf32, #tpu.memory_space<vmem>>, vector<1x8x32xf32>
    %23 = vector.shape_cast %22 : vector<1x8x32xf32> to vector<8x32xf32>
    %24 = vector.shape_cast %20 : vector<8x32xf32> to vector<1x8x32xf32>
    tpu.vector_store %arg6[%21, %c0_23, %c0_24], %24 {strides = array<i32>} : memref<1x8x32xf32, #tpu.memory_space<vmem>>, vector<1x8x32xf32>,
    %c1_i32 = arith.constant 1 : i32
    return
  }
  func.func @transform_0(%arg0: i32) -> (i32, i32, i32) {
    %c0_i32 = arith.constant 0 : i32
    %c0_i32_0 = arith.constant 0 : i32
    %c0_i32_1 = arith.constant 0 : i32
    return %arg0, %c0_i32, %c0_i32_0 : i32, i32, i32
  }
  func.func @transform_1(%arg0: i32) -> (i32, i32) {
    %c0_i32 = arith.constant 0 : i32
    %c0_i32_0 = arith.constant 0 : i32
    %c0_i32_1 = arith.constant 0 : i32
    return %c0_i32, %c0_i32_0 : i32, i32
  }
  func.func @transform_2(%arg0: i32) -> (i32, i32) {
    %c0_i32 = arith.constant 0 : i32
    %c0_i32_0 = arith.constant 0 : i32
    %c0_i32_1 = arith.constant 0 : i32
    return %c0_i32, %c0_i32_0 : i32, i32
  }
  func.func @transform_3(%arg0: i32) -> (i32, i32) {
    %c0_i32 = arith.constant 0 : i32
    %c0_i32_0 = arith.constant 0 : i32
    %c0_i32_1 = arith.constant 0 : i32
    return %c0_i32, %c0_i32_0 : i32, i32
  }
  func.func @transform_4(%arg0: i32) -> (i32, i32) {
    %c0_i32 = arith.constant 0 : i32
    %c0_i32_0 = arith.constant 0 : i32
    %c0_i32_1 = arith.constant 0 : i32
    return %c0_i32, %c0_i32_0 : i32, i32
  }
  func.func @transform_5(%arg0: i32) -> (i32, i32, i32) {
    %c0_i32 = arith.constant 0 : i32
    %c0_i32_0 = arith.constant 0 : i32
    %c0_i32_1 = arith.constant 0 : i32
    return %arg0, %c0_i32, %c0_i32_0 : i32, i32, i32
  }
}

</mosaic_0001>

<bundles_post_ra>
// kernel: _fft2_impl.1
= control target key start
LH: loop header
LB: loop body
LE: loop exit
PB: predicated region body
PF: predicated region fallthrough
CT: control target
= control target key end

     0   :  { %10 = vsyncpa [#allocation5], 0  ;;  %s1086_s0 = inlined_call_operand.hbm [shape: f32[2,8,32], index: 0, kind: input, shape index: {}]   ;;  %s1087_s1 = inlined_call_operand.hbm [shape: f32[32,32], index: 1, kind: input, shape index: {}]   ;;  %s1088_s2 = inlined_call_operand.hbm [shape: f32[32,32], index: 2, kind: input, shape index: {}]   ;;  %s1089_s3 = inlined_call_operand.hbm [shape: f32[8,8], index: 3, kind: input, shape index: {}]   ;;  %s1090_s4 = inlined_call_operand.hbm [shape: f32[8,8], index: 4, kind: input, shape index: {}]   ;;  %s1091_s5 = inlined_call_operand.hbm [shape: f32[2,8,32], index: 5, kind: output, shape index: {}]  }
   0x1   :  { %12 = vsyncpa [#allocation5 + $0x1], 0 }
   0x2   :  { %13 = vsyncpa [#allocation8], 0 }
   0x3   :  { %14 = vsyncpa [#allocation11], 0 }
   0x4   :  { %15 = vsyncpa [#allocation6], 0 }
   0x5   :  { %17 = vsyncpa [#allocation6 + $0x1], 0  ;;  %s910_s18 = smov 0   ;;  %s912_s19 = smov 0  }
   0x6   :  { %s914_s20 = smov 0   ;;  %s916_s21 = smov 0  }
   0x7 LB: > { %s175_s24 = sshll.u32 %s1087_s1, 4  ;;  %s934_s25 = sadd.s32 4294967295, %s872_s21   ;;  %s872_s21 = sphi %s916_s21, %s1103_s21   ;;  %s868_s20 = sphi %s914_s20, %s1102_s20   ;;  %s864_s19 = sphi %s912_s19, %s1101_s19   ;;  %s860_s18 = sphi %s910_s18, %s1100_s18   ;;  %s176_s24 = int_to_ptr.hbm [resolvable:$true] %s175_s24 }
   0x8   : > { %p536_p0 = scmp.ge.s32.totalorder %s872_s21, 1  ;;  %p44_p1 = scmp.eq.s32.totalorder %s934_s25, 0 }
   0x9   : > { %p164_p2 = scmp.lt.s32.totalorder %s872_s21, 3  ;;  %s874_s27 = smov [#allocation7]  }
   0xa   : > { %s177_s28 = sshll.u32 %s874_s27, 4  ;;  %s204_s6 = sshll.u32 %s1089_s3, 4  ;;  %s178_s28 = int_to_ptr.vmem [resolvable:$true] %s177_s28  ;;  %s205_s6 = int_to_ptr.hbm [resolvable:$true] %s204_s6 }
   0xb   : > { %p939_p3 = pnand %p536_p0, %p164_p2  ;;  %s189_s10 = sshll.u32 %s1088_s2, 4  ;;  %s190_s10 = int_to_ptr.hbm [resolvable:$true] %s189_s10 }
   0xc   : > { %s875_s11 = smov [#allocation10]   ;;  %s876_s13 = smov 128  }
   0xd   : > { %p579_p4 = pneg %p939_p3  ;;  %s206_s12 = sshll.u32 %s875_s11, 4  ;;  %s207_s12 = int_to_ptr.vmem [resolvable:$true] %s206_s12 }
   0xe   : > { %s877_s14 = smov 8   ;;  %s216_s17 = sshll.u32 %s1090_s4, 4  ;;  %s217_s17 = int_to_ptr.hbm [resolvable:$true] %s216_s17 }
   0xf   : > { %p951_p6 = pnand %p579_p4, %p44_p1  ;;  %s878_s22 = smov [#allocation9]  }
  0x10   : > { %s191_s23 = sshll.u32 %s878_s22, 4  ;;  %s971_s29 = sadd.s32 1, %s872_s21   ;;  %s192_s23 = int_to_ptr.vmem [resolvable:$true] %s191_s23 }
  0x11   : > { %582 = dma.hbm_to_vmem [thread:$0]  (!%p951_p6), %s176_s24, 512, %s178_s28, [#allocation8], %s876_s13, %s876_s13, %s877_s14  }
  0x12   : > { %588 = dma.hbm_to_vmem [thread:$0]  (!%p951_p6), %s205_s6, 128, %s207_s12, [#allocation11]  }
  0x13   : > { %585 = dma.hbm_to_vmem [thread:$0]  (!%p951_p6), %s190_s10, 512, %s192_s23, [#allocation8], %s876_s13, %s876_s13, %s877_s14  }
  0x14   : > { %s879_s24 = smov [#allocation12]   ;;  %s535_s28 = sadd.s32 4294967294, %s872_s21  }
  0x15   : > { %s218_s27 = sshll.u32 %s879_s24, 4  ;;  %s27_s30 = ssub.s32 %s872_s21, %s971_s29  ;;  %s219_s27 = int_to_ptr.vmem [resolvable:$true] %s218_s27 }
  0x16   : > { %591 = dma.hbm_to_vmem [thread:$0]  (!%p951_p6), %s217_s17, 128, %s219_s27, [#allocation11]  }
  0x17   : > { %s30_s6 = sadd.s32 1, %s868_s20  ;;  %p28_p7 = scmp.eq.s32.totalorder %s27_s30, 0 }
  0x18   : > { %p37_p8 = scmp.ne.s32.totalorder %s868_s20, %s864_s19  ;;  %p38_p9 = scmp.eq.s32.totalorder %s872_s21, 0 }
  0x19   : > { %p43_p10 = scmp.ne.s32.totalorder %s864_s19, %s860_s18  ;;  %p151_p13 = scmp.eq.s32.totalorder %s934_s25, 1 }
  0x1a   : > { %s982_s8 = scalar_select %p28_p7, %s868_s20, %s30_s6  }
  0x1b   : > { %p984_p11 = por %p38_p9, %p37_p8  ;;  %p990_p12 = por %p44_p1, %p43_p10 }
  0x1c   : > { %p157_p0 = scmp.eq.s32.totalorder %s535_s28, 1  ;;  %p604_p2 = scmp.lt.s32.totalorder %s872_s21, 2 }
  0x1d   : > { %s229_s10 = sand.u32 1, %s868_s20   ;;  %p997_p4 = por %p151_p13, %p37_p8 }
  0x1e   : > { %p1001_p6 = por %p157_p0, %p43_p10  ;;  %s542_s13 = sshll.u32 %s229_s10, 3 }
  0x1f   : > { %s543_s14 = sshll.u32 %s872_s21, 3  ;;  %s233_s22 = scalar_lea.vmem [#allocation4], %s542_s13 }
  0x20   : > { %s237_s17 = scalar_lea.hbm %s1086_s0, %s543_s14  ;;  %s241_s23 = sshll.u32 %s233_s22, 4  ;;  %s242_s23 = int_to_ptr.vmem [resolvable:$true] %s241_s23 }
  0x21   : > { %s239_s24 = sshll.u32 %s237_s17, 4  ;;  %p1011_p7 = pnand %p604_p2, %p984_p11  ;;  %s240_s24 = int_to_ptr.hbm [resolvable:$true] %s239_s24 }
  0x22   : > { %s230_s28 = scalar_lea.sflag [#allocation5], %s229_s10  ;;  %s768_s30 = sshra.s32 %s240_s24, 4  ;;  %s769_s30 = int_to_ptr.hbm [resolvable:$true] %s768_s30 }
  0x23   : > { %s770_s6 = scalar_lea.hbm %s769_s30, 8  ;;  %p772_p9 = pneg %p1011_p7 }
  0x24   : > { %p771_p8 = scmp.ne.s32.totalorder %s769_s30, %s770_s6  ;;  %s775_s15 = scalar_lea.hbm %s1086_s0, 16 }
  0x25   : > { %p776_p11 = scmp.lt.s32.totalorder %s769_s30, %s1086_s0  ;;  %p777_p0 = scmp.lt.s32.totalorder %s775_s15, %s770_s6 }
  0x26   : > { %p773_p10 = pnand %p772_p9, %p771_p8 }
  0x27   : > { %p778_p2 = por %p777_p0, %p776_p11 }
  0x28   : > { %p774_p13 = pneg %p773_p10 }
  0x2a   : > { %p779_p5 = pnand %p778_p2, %p774_p13 }
  0x2c   : > { %782 = shalt.err (!%p779_p5)
}
  0x2d   : > { %595 = dma.hbm_to_vmem [thread:$0]  (!%p1011_p7), %s240_s24, 128, %s242_s23, %s230_s28  }
  0x2e   : > { %250 = sbr.rel (%p939_p3) target bundleno = 337 (0x151), region = 40  ;;  %s1028_s10 = sand.u32 (!%p939_p3), 1, %s864_s19  }
  0x2f   : > { %s545_s17 = sshll.u32 (!%p939_p3), %s1028_s10, 3  ;;  %s253_s22 = scalar_lea.sflag (!%p939_p3), [#allocation5], %s1028_s10 }
  0x30   : > { %s256_s30 = scalar_lea.vmem (!%p939_p3), [#allocation4], %s545_s17 }
  0x33   : > { %843 = dma.done.wait (%p990_p12), %s253_s22, 128  }
  0x34   : > { %845 = vsyncadd (%p990_p12), %s253_s22, 4294967168 }
  0x35   : > { %847 = dma.done.wait (%p44_p1), [#allocation8], 1024  }
  0x36   : > { %849 = vsyncadd (%p44_p1), [#allocation8], 4294966272 }
  0x37   : > { %851 = dma.done.wait (%p44_p1), [#allocation11], 256  }
  0x38   : > { %853 = vsyncadd (%p44_p1), [#allocation11], 4294967040  ;;  %v308_v0 = vld [vmem:[#allocation7 + $0x18] sm:$0xff]  ;;  %v307_v2 = vld [vmem:[#allocation7 + $0x10] sm:$0xff]  ;;  %vm309_vm0 = vcmask 261120   ;;  %vm363_vm1 = vcmask 64512  }
  0x39   : > { %v336_v1 = vld [vmem:[#allocation9 + $0x18] sm:$0xff]  ;;  %325 = vmatpush.msra.mxu0 %v308_v0  ;;  %v335_v3 = vld [vmem:[#allocation9 + $0x10] sm:$0xff]  ;;  %v306_v4 = vld [vmem:[#allocation7 + $0x8] sm:$0xff]  ;;  %s556_s26 = sshll.u32 %s934_s25, 3  ;;  %s303_s27 = scalar_lea.vmem [#allocation13], %s545_s17 }
  0x3a   : > { %349 = vmatpush.msra.mxu1 %v336_v1  ;;  %v334_v5 = vld [vmem:[#allocation9 + $0x8] sm:$0xff]  ;;  %v305_v6 = vld [vmem:[#allocation7] sm:$0xff]  ;;  %v304_v8 = vld [vmem:[%s256_s30] sm:$0xff]  ;;  %s422_s24 = scalar_lea.hbm %s1091_s5, %s556_s26  ;;  %s424_s28 = sshll.u32 %s303_s27, 4  ;;  %s425_s28 = int_to_ptr.vmem [resolvable:$true] %s424_s28 }
  0x3b   : > { %326 = vmatpush.msra.mxu0 %v307_v2  ;;  %v333_v7 = vld [vmem:[#allocation9] sm:$0xff]  ;;  %v361_v13 = vld [vmem:[#allocation12] sm:$0xff]  ;;  %s426_s6 = sshll.u32 %s422_s24, 4  ;;  %s412_s13 = scalar_lea.sflag [#allocation6], %s1028_s10  ;;  %s427_s6 = int_to_ptr.hbm [resolvable:$true] %s426_s6 }
  0x3c   : > { %350 = vmatpush.msra.mxu1 %v335_v3  ;;  %v359_v11 = vld [vmem:[#allocation10] sm:$0xff]  ;;  %s812_s14 = sshra.s32 %s427_s6, 4  ;;  %s818_s9 = scalar_lea.hbm %s1091_s5, 16  ;;  %s813_s14 = int_to_ptr.hbm [resolvable:$true] %s812_s14 }
  0x3d   : > { %327 = vmatpush.msra.mxu0 %v306_v4  ;;  %s814_s25 = scalar_lea.hbm %s813_s14, 8  ;;  %p819_p12 = scmp.lt.s32.totalorder %s813_s14, %s1091_s5 }
  0x3e   : > { %351 = vmatpush.msra.mxu1 %v334_v5  ;;  %p815_p1 = scmp.ne.s32.totalorder %s813_s14, %s814_s25  ;;  %p820_p7 = scmp.lt.s32.totalorder %s818_s9, %s814_s25 }
  0x3f   : > { %328 = vmatpush.msra.mxu0 %v305_v6 }
  0x40   : > { %352 = vmatpush.msra.mxu1 %v333_v7  ;;  %551 = vmatmul.msk.f32.vlgmr.msra.gmra.mxu0 %vm309_vm0, %v304_v8  ;;  %p816_p3 = pnand %p815_p1, %p997_p4  ;;  %p821_p8 = por %p820_p7, %p819_p12 }
  0x41   : > { %552 = vmatmul.msk.f32.vlgmr.msra.gmra.mxu1 %vm309_vm0, %v304_v8 }
  0x42   : > { %p817_p5 = pneg %p816_p3 }
  0x44   : > { %p822_p9 = pnand %p821_p8, %p817_p5 }
  0xbd   : > { %v330_v9 = vpop.f32.mrf.mxu0 }
  0xbe   : > { %v354_v10 = vpop.f32.mrf.mxu1  ;;  %357 = vst.msk [vmem:[#allocation2] sm:$0xff] %vm309_vm0, %v330_v9 }
  0xbf   : > { %358 = vst.msk [vmem:[#allocation3] sm:$0xff] %vm309_vm0, %v354_v10 }
  0xc5   : > { %v360_v12 = vld [vmem:[#allocation2] sm:$0xff] }
  0xc6   : > { %v362_v14 = vld [vmem:[#allocation3] sm:$0xff]  ;;  %405 = vmatpush.msra.mxu3 %v360_v12 }
  0xc7   : > { %382 = vmatpush.msra.mxu2 %v362_v14  ;;  %554 = vmatmul.msk.f32.vlgmr.msra.gmra.mxu3 %vm363_vm1, %v359_v11 }
  0xc8   : > { %553 = vmatmul.msk.f32.vlgmr.msra.gmra.mxu2 %vm363_vm1, %v361_v13 }
 0x14a   : > { %v407_v15 = vpop.f32.mrf.mxu3 }
 0x14b   : > { %v384_v16 = vpop.f32.mrf.mxu2 }
 0x14c   : > { %v408_v17 = vadd.f32 %v407_v15, %v384_v16 }
 0x14e   : > { %410 = vst.msk [vmem:[%s303_s27] sm:$0xff] %vm309_vm0, %v408_v17 }
 0x14f   : > { %825 = shalt.err (!%p822_p9)
}
 0x150   : > { %577 = dma.vmem_to_hbm [thread:$0]  (%p997_p4), %s425_s28, 128, %s427_s6, %s412_s13  }
 0x151 PF: > { %s438_s10 = sand.u32 1, %s860_s18   ;;  %p1099_p10 = scmp.ge.s32.totalorder %s872_s21, 2 }
 0x152   : > { %s439_s30 = scalar_lea.sflag [#allocation6], %s438_s10 }
 0x153   : > { %p597_p13 = pnand %p1099_p10, %p1001_p6 }
 0x155   : > { %p598_p11 = pneg %p597_p13 }
 0x157   : > { %855 = dma.done.wait (%p598_p11), %s439_s30, 128  }
 0x158   : > { %857 = vsyncadd (%p598_p11), %s439_s30, 4294967168  ;;  %p20_p0 = scmp.ge.s32.totalorder %s971_s29, 4   ;;  %s1100_s18 = smov %s864_s19 }
 0x159   : > { %s1101_s19 = smov %s868_s20  ;;  %s1102_s20 = smov %s982_s8 }
 0x15a   : > { %s1103_s21 = smov %s971_s29  ;;  %22 = sbr.rel (!%p20_p0) target bundleno = 7 (0x7), region = 101 }
 0x15f   :  { %445 = vsyncpa [#allocation5], 1 }
 0x160   :  { %447 = vsyncpa [#allocation5 + $0x1], 1 }
 0x161   :  { %448 = vsyncpa [#allocation8], 1 }
 0x162   :  { %449 = vsyncpa [#allocation11], 1 }
 0x163   :  { %450 = vsyncpa [#allocation6], 1 }
 0x164   :  { %452 = vsyncpa [#allocation6 + $0x1], 1 }

// kernel: _fft2_impl.1
= control target key start
LH: loop header
LB: loop body
LE: loop exit
PB: predicated region body
PF: predicated region fallthrough
CT: control target
= control target key end

     0   :  { %10 = vsyncpa [#allocation5], 0  ;;  %s1086_s0 = inlined_call_operand.hbm [shape: f32[2,8,32], index: 0, kind: input, shape index: {}]   ;;  %s1087_s1 = inlined_call_operand.hbm [shape: f32[32,32], index: 1, kind: input, shape index: {}]   ;;  %s1088_s2 = inlined_call_operand.hbm [shape: f32[32,32], index: 2, kind: input, shape index: {}]   ;;  %s1089_s3 = inlined_call_operand.hbm [shape: f32[8,8], index: 3, kind: input, shape index: {}]   ;;  %s1090_s4 = inlined_call_operand.hbm [shape: f32[8,8], index: 4, kind: input, shape index: {}]   ;;  %s1091_s5 = inlined_call_operand.hbm [shape: f32[2,8,32], index: 5, kind: output, shape index: {}]  }
   0x1   :  { %12 = vsyncpa [#allocation5 + $0x1], 0 }
   0x2   :  { %13 = vsyncpa [#allocation8], 0 }
   0x3   :  { %14 = vsyncpa [#allocation11], 0 }
   0x4   :  { %15 = vsyncpa [#allocation6], 0 }
   0x5   :  { %17 = vsyncpa [#allocation6 + $0x1], 0  ;;  %s910_s18 = smov 0   ;;  %s912_s19 = smov 0  }
   0x6   :  { %s914_s20 = smov 0   ;;  %s916_s21 = smov 0  }
   0x7 LB: > { %s175_s24 = sshll.u32 %s1087_s1, 4  ;;  %s934_s25 = sadd.s32 4294967295, %s872_s21   ;;  %s872_s21 = sphi %s916_s21, %s1103_s21   ;;  %s868_s20 = sphi %s914_s20, %s1102_s20   ;;  %s864_s19 = sphi %s912_s19, %s1101_s19   ;;  %s860_s18 = sphi %s910_s18, %s1100_s18   ;;  %s176_s24 = int_to_ptr.hbm [resolvable:$true] %s175_s24 }
   0x8   : > { %p536_p0 = scmp.ge.s32.totalorder %s872_s21, 1  ;;  %p44_p1 = scmp.eq.s32.totalorder %s934_s25, 0 }
   0x9   : > { %p164_p2 = scmp.lt.s32.totalorder %s872_s21, 3  ;;  %s874_s27 = smov [#allocation7]  }
   0xa   : > { %s177_s28 = sshll.u32 %s874_s27, 4  ;;  %s204_s6 = sshll.u32 %s1089_s3, 4  ;;  %s178_s28 = int_to_ptr.vmem [resolvable:$true] %s177_s28  ;;  %s205_s6 = int_to_ptr.hbm [resolvable:$true] %s204_s6 }
   0xb   : > { %p939_p3 = pnand %p536_p0, %p164_p2  ;;  %s189_s10 = sshll.u32 %s1088_s2, 4  ;;  %s190_s10 = int_to_ptr.hbm [resolvable:$true] %s189_s10 }
   0xc   : > { %s875_s11 = smov [#allocation10]   ;;  %s876_s13 = smov 128  }
   0xd   : > { %p579_p4 = pneg %p939_p3  ;;  %s206_s12 = sshll.u32 %s875_s11, 4  ;;  %s207_s12 = int_to_ptr.vmem [resolvable:$true] %s206_s12 }
   0xe   : > { %s877_s14 = smov 8   ;;  %s216_s17 = sshll.u32 %s1090_s4, 4  ;;  %s217_s17 = int_to_ptr.hbm [resolvable:$true] %s216_s17 }
   0xf   : > { %p951_p6 = pnand %p579_p4, %p44_p1  ;;  %s878_s22 = smov [#allocation9]  }
  0x10   : > { %s191_s23 = sshll.u32 %s878_s22, 4  ;;  %s971_s29 = sadd.s32 1, %s872_s21   ;;  %s192_s23 = int_to_ptr.vmem [resolvable:$true] %s191_s23 }
  0x11   : > { %582 = dma.hbm_to_vmem [thread:$0]  (!%p951_p6), %s176_s24, 512, %s178_s28, [#allocation8], %s876_s13, %s876_s13, %s877_s14  }
  0x12   : > { %588 = dma.hbm_to_vmem [thread:$0]  (!%p951_p6), %s205_s6, 128, %s207_s12, [#allocation11]  }
  0x13   : > { %585 = dma.hbm_to_vmem [thread:$0]  (!%p951_p6), %s190_s10, 512, %s192_s23, [#allocation8], %s876_s13, %s876_s13, %s877_s14  }
  0x14   : > { %s879_s24 = smov [#allocation12]   ;;  %s535_s28 = sadd.s32 4294967294, %s872_s21  }
  0x15   : > { %s218_s27 = sshll.u32 %s879_s24, 4  ;;  %s27_s30 = ssub.s32 %s872_s21, %s971_s29  ;;  %s219_s27 = int_to_ptr.vmem [resolvable:$true] %s218_s27 }
  0x16   : > { %591 = dma.hbm_to_vmem [thread:$0]  (!%p951_p6), %s217_s17, 128, %s219_s27, [#allocation11]  }
  0x17   : > { %s30_s6 = sadd.s32 1, %s868_s20  ;;  %p28_p7 = scmp.eq.s32.totalorder %s27_s30, 0 }
  0x18   : > { %p37_p8 = scmp.ne.s32.totalorder %s868_s20, %s864_s19  ;;  %p38_p9 = scmp.eq.s32.totalorder %s872_s21, 0 }
  0x19   : > { %p43_p10 = scmp.ne.s32.totalorder %s864_s19, %s860_s18  ;;  %p151_p13 = scmp.eq.s32.totalorder %s934_s25, 1 }
  0x1a   : > { %s982_s8 = scalar_select %p28_p7, %s868_s20, %s30_s6  }
  0x1b   : > { %p984_p11 = por %p38_p9, %p37_p8  ;;  %p990_p12 = por %p44_p1, %p43_p10 }
  0x1c   : > { %p157_p0 = scmp.eq.s32.totalorder %s535_s28, 1  ;;  %p604_p2 = scmp.lt.s32.totalorder %s872_s21, 2 }
  0x1d   : > { %s229_s10 = sand.u32 1, %s868_s20   ;;  %p997_p4 = por %p151_p13, %p37_p8 }
  0x1e   : > { %p1001_p6 = por %p157_p0, %p43_p10  ;;  %s542_s13 = sshll.u32 %s229_s10, 3 }
  0x1f   : > { %s543_s14 = sshll.u32 %s872_s21, 3  ;;  %s233_s22 = scalar_lea.vmem [#allocation4], %s542_s13 }
  0x20   : > { %s237_s17 = scalar_lea.hbm %s1086_s0, %s543_s14  ;;  %s241_s23 = sshll.u32 %s233_s22, 4  ;;  %s242_s23 = int_to_ptr.vmem [resolvable:$true] %s241_s23 }
  0x21   : > { %s239_s24 = sshll.u32 %s237_s17, 4  ;;  %p1011_p7 = pnand %p604_p2, %p984_p11  ;;  %s240_s24 = int_to_ptr.hbm [resolvable:$true] %s239_s24 }
  0x22   : > { %s230_s28 = scalar_lea.sflag [#allocation5], %s229_s10  ;;  %s768_s30 = sshra.s32 %s240_s24, 4  ;;  %s769_s30 = int_to_ptr.hbm [resolvable:$true] %s768_s30 }
  0x23   : > { %s770_s6 = scalar_lea.hbm %s769_s30, 8  ;;  %p772_p9 = pneg %p1011_p7 }
  0x24   : > { %p771_p8 = scmp.ne.s32.totalorder %s769_s30, %s770_s6  ;;  %s775_s15 = scalar_lea.hbm %s1086_s0, 16 }
  0x25   : > { %p776_p11 = scmp.lt.s32.totalorder %s769_s30, %s1086_s0  ;;  %p777_p0 = scmp.lt.s32.totalorder %s775_s15, %s770_s6 }
  0x26   : > { %p773_p10 = pnand %p772_p9, %p771_p8 }
  0x27   : > { %p778_p2 = por %p777_p0, %p776_p11 }
  0x28   : > { %p774_p13 = pneg %p773_p10 }
  0x2a   : > { %p779_p5 = pnand %p778_p2, %p774_p13 }
  0x2c   : > { %782 = shalt.err (!%p779_p5)
}
  0x2d   : > { %595 = dma.hbm_to_vmem [thread:$0]  (!%p1011_p7), %s240_s24, 128, %s242_s23, %s230_s28  }
  0x2e   : > { %250 = sbr.rel (%p939_p3) target bundleno = 337 (0x151), region = 40  ;;  %s1028_s10 = sand.u32 (!%p939_p3), 1, %s864_s19  }
  0x2f   : > { %s545_s17 = sshll.u32 (!%p939_p3), %s1028_s10, 3  ;;  %s253_s22 = scalar_lea.sflag (!%p939_p3), [#allocation5], %s1028_s10 }
  0x30   : > { %s256_s30 = scalar_lea.vmem (!%p939_p3), [#allocation4], %s545_s17 }
  0x33   : > { %843 = dma.done.wait (%p990_p12), %s253_s22, 128  }
  0x34   : > { %845 = vsyncadd (%p990_p12), %s253_s22, 4294967168 }
  0x35   : > { %847 = dma.done.wait (%p44_p1), [#allocation8], 1024  }
  0x36   : > { %849 = vsyncadd (%p44_p1), [#allocation8], 4294966272 }
  0x37   : > { %851 = dma.done.wait (%p44_p1), [#allocation11], 256  }
  0x38   : > { %853 = vsyncadd (%p44_p1), [#allocation11], 4294967040  ;;  %v308_v0 = vld [vmem:[#allocation7 + $0x18] sm:$0xff]  ;;  %v307_v2 = vld [vmem:[#allocation7 + $0x10] sm:$0xff]  ;;  %vm309_vm0 = vcmask 261120   ;;  %vm363_vm1 = vcmask 64512  }
  0x39   : > { %v336_v1 = vld [vmem:[#allocation9 + $0x18] sm:$0xff]  ;;  %325 = vmatpush.msra.mxu0 %v308_v0  ;;  %v335_v3 = vld [vmem:[#allocation9 + $0x10] sm:$0xff]  ;;  %v306_v4 = vld [vmem:[#allocation7 + $0x8] sm:$0xff]  ;;  %s556_s26 = sshll.u32 %s934_s25, 3  ;;  %s303_s27 = scalar_lea.vmem [#allocation13], %s545_s17 }
  0x3a   : > { %349 = vmatpush.msra.mxu1 %v336_v1  ;;  %v334_v5 = vld [vmem:[#allocation9 + $0x8] sm:$0xff]  ;;  %v305_v6 = vld [vmem:[#allocation7] sm:$0xff]  ;;  %v304_v8 = vld [vmem:[%s256_s30] sm:$0xff]  ;;  %s422_s24 = scalar_lea.hbm %s1091_s5, %s556_s26  ;;  %s424_s28 = sshll.u32 %s303_s27, 4  ;;  %s425_s28 = int_to_ptr.vmem [resolvable:$true] %s424_s28 }
  0x3b   : > { %326 = vmatpush.msra.mxu0 %v307_v2  ;;  %v333_v7 = vld [vmem:[#allocation9] sm:$0xff]  ;;  %v361_v13 = vld [vmem:[#allocation12] sm:$0xff]  ;;  %s426_s6 = sshll.u32 %s422_s24, 4  ;;  %s412_s13 = scalar_lea.sflag [#allocation6], %s1028_s10  ;;  %s427_s6 = int_to_ptr.hbm [resolvable:$true] %s426_s6 }
  0x3c   : > { %350 = vmatpush.msra.mxu1 %v335_v3  ;;  %v359_v11 = vld [vmem:[#allocation10] sm:$0xff]  ;;  %s812_s14 = sshra.s32 %s427_s6, 4  ;;  %s818_s9 = scalar_lea.hbm %s1091_s5, 16  ;;  %s813_s14 = int_to_ptr.hbm [resolvable:$true] %s812_s14 }
  0x3d   : > { %327 = vmatpush.msra.mxu0 %v306_v4  ;;  %s814_s25 = scalar_lea.hbm %s813_s14, 8  ;;  %p819_p12 = scmp.lt.s32.totalorder %s813_s14, %s1091_s5 }
  0x3e   : > { %351 = vmatpush.msra.mxu1 %v334_v5  ;;  %p815_p1 = scmp.ne.s32.totalorder %s813_s14, %s814_s25  ;;  %p820_p7 = scmp.lt.s32.totalorder %s818_s9, %s814_s25 }
  0x3f   : > { %328 = vmatpush.msra.mxu0 %v305_v6 }
  0x40   : > { %352 = vmatpush.msra.mxu1 %v333_v7  ;;  %551 = vmatmul.msk.f32.vlgmr.msra.gmra.mxu0 %vm309_vm0, %v304_v8  ;;  %p816_p3 = pnand %p815_p1, %p997_p4  ;;  %p821_p8 = por %p820_p7, %p819_p12 }
  0x41   : > { %552 = vmatmul.msk.f32.vlgmr.msra.gmra.mxu1 %vm309_vm0, %v304_v8 }
  0x42   : > { %p817_p5 = pneg %p816_p3 }
  0x44   : > { %p822_p9 = pnand %p821_p8, %p817_p5 }
  0xbd   : > { %v330_v9 = vpop.f32.mrf.mxu0 }
  0xbe   : > { %v354_v10 = vpop.f32.mrf.mxu1  ;;  %357 = vst.msk [vmem:[#allocation2] sm:$0xff] %vm309_vm0, %v330_v9 }
  0xbf   : > { %358 = vst.msk [vmem:[#allocation3] sm:$0xff] %vm309_vm0, %v354_v10 }
  0xc5   : > { %v360_v12 = vld [vmem:[#allocation2] sm:$0xff] }
  0xc6   : > { %v362_v14 = vld [vmem:[#allocation3] sm:$0xff]  ;;  %405 = vmatpush.msra.mxu3 %v360_v12 }
  0xc7   : > { %382 = vmatpush.msra.mxu2 %v362_v14  ;;  %554 = vmatmul.msk.f32.vlgmr.msra.gmra.mxu3 %vm363_vm1, %v359_v11 }
  0xc8   : > { %553 = vmatmul.msk.f32.vlgmr.msra.gmra.mxu2 %vm363_vm1, %v361_v13 }
 0x14a   : > { %v407_v15 = vpop.f32.mrf.mxu3 }
 0x14b   : > { %v384_v16 = vpop.f32.mrf.mxu2 }
 0x14c   : > { %v408_v17 = vadd.f32 %v407_v15, %v384_v16 }
 0x14e   : > { %410 = vst.msk [vmem:[%s303_s27] sm:$0xff] %vm309_vm0, %v408_v17 }
 0x14f   : > { %825 = shalt.err (!%p822_p9)
}
 0x150   : > { %577 = dma.vmem_to_hbm [thread:$0]  (%p997_p4), %s425_s28, 128, %s427_s6, %s412_s13  }
 0x151 PF: > { %s438_s10 = sand.u32 1, %s860_s18   ;;  %p1099_p10 = scmp.ge.s32.totalorder %s872_s21, 2 }
 0x152   : > { %s439_s30 = scalar_lea.sflag [#allocation6], %s438_s10 }
 0x153   : > { %p597_p13 = pnand %p1099_p10, %p1001_p6 }
 0x155   : > { %p598_p11 = pneg %p597_p13 }
 0x157   : > { %855 = dma.done.wait (%p598_p11), %s439_s30, 128  }
 0x158   : > { %857 = vsyncadd (%p598_p11), %s439_s30, 4294967168  ;;  %p20_p0 = scmp.ge.s32.totalorder %s971_s29, 4   ;;  %s1100_s18 = smov %s864_s19 }
 0x159   : > { %s1101_s19 = smov %s868_s20  ;;  %s1102_s20 = smov %s982_s8 }
 0x15a   : > { %s1103_s21 = smov %s971_s29  ;;  %22 = sbr.rel (!%p20_p0) target bundleno = 7 (0x7), region = 101 }
 0x15f   :  { %445 = vsyncpa [#allocation5], 1 }
 0x160   :  { %447 = vsyncpa [#allocation5 + $0x1], 1 }
 0x161   :  { %448 = vsyncpa [#allocation8], 1 }
 0x162   :  { %449 = vsyncpa [#allocation11], 1 }
 0x163   :  { %450 = vsyncpa [#allocation6], 1 }
 0x164   :  { %452 = vsyncpa [#allocation6 + $0x1], 1 }

</bundles_post_ra>
